<compile_context>
chip_gen: v7x
topology: tpu7x:2x2x1
jax: 0.10.0
libtpu: 0.0.40
codegen_flags: <defaults>
</compile_context>

<pallas_src>
import functools

import jax
import jax.numpy as jnp
from jax.experimental import pallas as pl
from jax.experimental.pallas import tpu as pltpu

EPS = 1e-12  # matches torch.nn.functional.normalize default eps


def _netvlad_kernel(x_ref, w_ref, b_ref, c_ref, o_ref):
    """Processes a block of B batch elements per grid step.

    x_ref: (B, C, S)  NCHW-flattened descriptors (C on sublanes, S on lanes)
    w_ref: (K, C)     soft-assignment weights (nn.Linear layout)
    b_ref: (K, 1)     soft-assignment bias
    c_ref: (K, C)     centroids
    o_ref: (B, K, C)  normalized VLAD block (lane-dense, C on lanes)
    """
    B, C, S = x_ref.shape
    K = c_ref.shape[0]

    x = x_ref[...].astype(jnp.float32)                            # (B, C, S)

    # Descriptor-wise L2 normalization (F.normalize(x, p=2, dim=1)).  C sits on
    # sublanes, so this is a plain VPU add tree; clamping the *squared* norm at
    # EPS^2 preserves torch's max(norm, EPS) semantics exactly.
    inv_x = jax.lax.rsqrt(
        jnp.maximum(jnp.sum(x * x, axis=1, keepdims=True), EPS * EPS))
    xn = x * inv_x                                                 # (B, C, S)

    # Soft assignment in (K, S) orientation: logits[b] = W @ xn[b] + bias.
    # W is broadcast once per grid step (tiny: B*K*C f32).  Batched matmul with
    # the batch dim leading on both operands -> native MXU lowering.
    w = jnp.broadcast_to(w_ref[...].astype(jnp.float32)[None], (B, K, C))
    logits = jnp.einsum('bkc,bcs->bks', w, xn,
                        preferred_element_type=jnp.float32)        # (B, K, S)
    logits = logits + b_ref[...].astype(jnp.float32)[None]         # (1,K,1) bcast
    logits = logits - jnp.max(logits, axis=1, keepdims=True)
    e = jnp.exp(logits)
    # Exact reciprocal keeps the strict f32 tolerance vs. the reference.
    a = e * pl.reciprocal(jnp.sum(e, axis=1, keepdims=True))       # (B, K, S)

    # vlad[b,k,c] = sum_s a[b,k,s]*xn[b,c,s] - (sum_s a[b,k,s]) * centroid[k,c]
    # Contraction over s (lane dim of both operands) is the standard
    # flash-attention 'bqd,bkd->bqk' pattern -> native batched MXU matmul.
    vlad = jnp.einsum('bks,bcs->bkc', a, xn,
                      preferred_element_type=jnp.float32)          # (B, K, C)
    asum = jnp.sum(a, axis=-1)                                     # (B, K)
    vlad = vlad - asum[:, :, None] * c_ref[...].astype(jnp.float32)[None]

    # Intra-normalization (over C per cluster) fused with the global L2
    # normalization of the flattened (K*C,) vector into a single scale mul.
    sq = jnp.sum(vlad * vlad, axis=-1, keepdims=True)              # (B, K, 1)
    inv_row = jax.lax.rsqrt(jnp.maximum(sq, EPS * EPS))            # 1/max(|row|,EPS)
    gsq = jnp.sum(sq * inv_row * inv_row, axis=1, keepdims=True)   # (B, 1, 1)
    inv_g = jax.lax.rsqrt(jnp.maximum(gsq, EPS * EPS))
    o_ref[...] = (vlad * (inv_row * inv_g)).astype(o_ref.dtype)


def _vmem_limit_bytes():
    """Scoped-VMEM budget: ~3/4 of physical, capped at 100 MiB.

    v5e/v6e have 128 MiB physical (-> 96/100 MiB), v7x only 64 MiB per
    TensorCore (-> 48 MiB).  Falls back to 48 MiB (safe on every part).
    """
    try:
        cap = getattr(pltpu.get_tpu_info(), "vmem_capacity_bytes", None)
    except Exception:
        cap = None
    if not cap:
        return 48 * 1024 * 1024
    return int(min(cap * 3 // 4, 100 * 1024 * 1024))


def _pick_block_n(n, c, s, k, in_itemsize, out_itemsize, vmem_limit):
    """Largest batch tile whose estimated VMEM footprint fits ~60% of the limit,
    preferring >= 4 grid steps (>= 2 per TensorCore on dual-core parts)."""
    per_b = (2 * c * s * in_itemsize            # double-buffered input tile
             + 2 * k * c * out_itemsize         # double-buffered output tile
             + 4 * (2 * c * s                   # f32 x cast + xn
                    + 3 * k * s                 # logits / exp / a
                    + 2 * k * c))               # vlad + broadcast W
    cap = max(1, int(vmem_limit * 0.6) // per_b)
    divisors = [d for d in range(1, n + 1) if n % d == 0]
    for min_steps in (4, 2, 1):
        fits = [d for d in divisors if d <= cap and n // d >= min_steps]
        if fits:
            return max(fits)
    return 1


@functools.partial(jax.jit, static_argnames=("block_n", "vmem_limit"))
def _netvlad_call(x_ncs, fc_weight, bias_k1, centroids, *, block_n, vmem_limit):
    N, C, S = x_ncs.shape
    K, D = centroids.shape
    out_dtype = x_ncs.dtype

    cost = pl.CostEstimate(
        flops=4 * N * K * S * C,
        transcendentals=N * K * S,
        bytes_accessed=(N * C * S * jnp.dtype(x_ncs.dtype).itemsize
                        + N * K * D * jnp.dtype(out_dtype).itemsize
                        + (2 * K * D + K) * 4))

    vlad = pl.pallas_call(
        _netvlad_kernel,
        out_shape=jax.ShapeDtypeStruct((N, K, D), out_dtype),
        grid_spec=pltpu.PrefetchScalarGridSpec(
            num_scalar_prefetch=0,
            grid=(N // block_n,),
            in_specs=[
                pl.BlockSpec((block_n, C, S), lambda n: (n, 0, 0)),
                pl.BlockSpec((K, D), lambda n: (0, 0)),
                pl.BlockSpec((K, 1), lambda n: (0, 0)),
                pl.BlockSpec((K, D), lambda n: (0, 0)),
            ],
            out_specs=pl.BlockSpec((block_n, K, D), lambda n: (n, 0, 0)),
        ),
        compiler_params=pltpu.CompilerParams(
            dimension_semantics=("parallel",),
            vmem_limit_bytes=vmem_limit),
        cost_estimate=cost,
    )(x_ncs, fc_weight, bias_k1, centroids)

    return vlad.reshape(N, K * D)


def netvlad_voxel(x_nchw, fc_weight, fc_bias, centroids, *, block_n=None):
    """x_nchw: (N, C, H, W); fc_weight: (K, C); fc_bias: (K,); returns (N, K*C)."""
    N, C, H, W = x_nchw.shape
    K, D = centroids.shape
    assert C == D
    S = H * W

    vmem_limit = _vmem_limit_bytes()
    if block_n is None:
        itemsize = jnp.dtype(x_nchw.dtype).itemsize
        block_n = _pick_block_n(N, C, S, K, itemsize, itemsize, vmem_limit)
    assert N % block_n == 0

    # Free reshape (row-major over H,W matches torch .view(N, C, -1)); the
    # kernel consumes the NCS orientation directly -- no transpose anywhere.
    x_ncs = x_nchw.reshape(N, C, S)
    bias_k1 = fc_bias.reshape(K, 1)
    return _netvlad_call(x_ncs, fc_weight, bias_k1, centroids,
                         block_n=int(block_n), vmem_limit=int(vmem_limit))


def _reference(x_nchw, fc_weight, fc_bias, centroids):
    """Pure-JAX reference mirroring the PyTorch forward semantics."""
    N, C, H, W = x_nchw.shape
    x = x_nchw / jnp.maximum(
        jnp.linalg.norm(x_nchw, axis=1, keepdims=True), EPS)
    xf = x.reshape(N, C, H * W)                                    # (N, C, S)
    logits = jnp.einsum('ncs,kc->nks', xf, fc_weight,
                        precision='highest') + fc_bias[None, :, None]
    a = jax.nn.softmax(logits, axis=1)                             # (N, K, S)
    vlad = jnp.einsum('nks,ncs->nkc', a, xf, precision='highest') \
        - jnp.sum(a, axis=-1)[..., None] * centroids[None]
    vlad = vlad / jnp.maximum(
        jnp.linalg.norm(vlad, axis=2, keepdims=True), EPS)
    vlad = vlad.reshape(N, -1)
    vlad = vlad / jnp.maximum(
        jnp.linalg.norm(vlad, axis=1, keepdims=True), EPS)
    return vlad


if __name__ == "__main__":
    # Small shapes consistent with the module: dim=128 descriptors, 16 clusters.
    N, D, H, W = 8, 128, 8, 8
    K = 16

    key = jax.random.PRNGKey(0)
    kx, kw, kb, kc = jax.random.split(key, 4)

    x = jax.random.normal(kx, (N, D, H, W), dtype=jnp.float32)
    # nn.Linear(dim, num_clusters): weight (K, D), bias (K)
    fc_weight = jax.random.normal(kw, (K, D), dtype=jnp.float32) * (1.0 / D ** 0.5)
    fc_bias = jax.random.normal(kb, (K,), dtype=jnp.float32) * 0.01
    # centroids ~ torch.rand(K, D) -> uniform [0, 1)
    centroids = jax.random.uniform(kc, (K, D), dtype=jnp.float32)

    out = jax.block_until_ready(netvlad_voxel(x, fc_weight, fc_bias, centroids))
    ref = jax.block_until_ready(_reference(x, fc_weight, fc_bias, centroids))

    assert out.shape == (N, K * D)
    assert jnp.allclose(out, ref, atol=1e-4, rtol=1e-4), "mismatch vs reference"

    print("KERNEL_OK")
</pallas_src>

<mosaic_0001>
module attributes {stable_mosaic.version = 11 : i64} {
  func.func @_netvlad_kernel(%arg0: i32, %arg1: memref<2x128x64xf32, #tpu.memory_space<vmem>>, %arg2: memref<16x128xf32, #tpu.memory_space<vmem>>, %arg3: memref<16x1xf32, #tpu.memory_space<vmem>>, %arg4: memref<16x128xf32, #tpu.memory_space<vmem>>, %arg5: memref<2x16x128xf32, #tpu.memory_space<vmem>>) attributes {dimension_semantics = [#tpu.dimension_semantics<parallel>], iteration_bounds = array<i64: 4>, scalar_prefetch = 0 : i64, scratch_operands = 0 : i64, tpu.core_type = #tpu.core_type<tc>, window_params = [{transform_indices = @transform_0, window_bounds = array<i64: 2, 128, 64>}, {pipeline_mode = #tpu.pipeline_mode<synchronous>, transform_indices = @transform_1, window_bounds = array<i64: 16, 128>}, {pipeline_mode = #tpu.pipeline_mode<synchronous>, transform_indices = @transform_2, window_bounds = array<i64: 16, 1>}, {pipeline_mode = #tpu.pipeline_mode<synchronous>, transform_indices = @transform_3, window_bounds = array<i64: 16, 128>}, {transform_indices = @transform_4, window_bounds = array<i64: 2, 16, 128>}]} {
    %c0 = arith.constant 0 : index
    %c0_0 = arith.constant 0 : index
    %c0_1 = arith.constant 0 : index
    %0 = vector.load %arg1[%c0, %c0_0, %c0_1] : memref<2x128x64xf32, #tpu.memory_space<vmem>>, vector<2x128x64xf32>
    %1 = arith.mulf %0, %0 : vector<2x128x64xf32>
    %cst = arith.constant dense<0.000000e+00> : vector<2x64xf32>
    %2 = vector.multi_reduction <add>, %1, %cst [1] : vector<2x128x64xf32> to vector<2x64xf32>
    %3 = vector.shape_cast %2 : vector<2x64xf32> to vector<2x1x64xf32>
    %cst_2 = arith.constant 1.000000e-24 : f32
    %4 = vector.broadcast %cst_2 : f32 to vector<2x1x64xf32>
    %5 = arith.maximumf %3, %4 : vector<2x1x64xf32>
    %6 = math.rsqrt %5 : vector<2x1x64xf32>
    %7 = vector.broadcast %6 : vector<2x1x64xf32> to vector<2x128x64xf32>
    %8 = arith.mulf %0, %7 : vector<2x128x64xf32>
    %c0_3 = arith.constant 0 : index
    %c0_4 = arith.constant 0 : index
    %9 = vector.load %arg2[%c0_3, %c0_4] : memref<16x128xf32, #tpu.memory_space<vmem>>, vector<16x128xf32>
    %10 = vector.shape_cast %9 : vector<16x128xf32> to vector<1x16x128xf32>
    %11 = vector.shape_cast %10 : vector<1x16x128xf32> to vector<1x16x128xf32>
    %12 = vector.broadcast %11 : vector<1x16x128xf32> to vector<2x16x128xf32>
    "tpu.trace_start"() <{level = 10 : i32, message = "bkc,bcs->bks"}> : () -> ()
    %cst_5 = arith.constant dense<0.000000e+00> : vector<2x16x64xf32>
    %13 = tpu.matmul %12, %8, %cst_5 {dimension_numbers = #tpu.dot_dimension_numbers<[2], [1], [1], [2], [0, 0, 0, 1, 1, 2], [0], [0]>} : vector<2x16x128xf32>, vector<2x128x64xf32>, vector<2x16x64xf32> -> vector<2x16x64xf32>
    "tpu.trace_stop"() : () -> ()
    %c0_6 = arith.constant 0 : index
    %c0_7 = arith.constant 0 : index
    %14 = vector.load %arg3[%c0_6, %c0_7] : memref<16x1xf32, #tpu.memory_space<vmem>>, vector<16x1xf32>
    %15 = vector.shape_cast %14 : vector<16x1xf32> to vector<1x16x1xf32>
    %16 = vector.broadcast %15 : vector<1x16x1xf32> to vector<2x16x64xf32>
    %17 = arith.addf %13, %16 : vector<2x16x64xf32>
    %cst_8 = arith.constant dense<0xFF800000> : vector<2x64xf32>
    %18 = vector.multi_reduction <maximumf>, %17, %cst_8 [1] : vector<2x16x64xf32> to vector<2x64xf32>
    %19 = vector.shape_cast %18 : vector<2x64xf32> to vector<2x1x64xf32>
    %20 = vector.broadcast %19 : vector<2x1x64xf32> to vector<2x16x64xf32>
    %21 = arith.subf %17, %20 : vector<2x16x64xf32>
    %22 = math.exp %21 : vector<2x16x64xf32>
    %cst_9 = arith.constant dense<0.000000e+00> : vector<2x64xf32>
    %23 = vector.multi_reduction <add>, %22, %cst_9 [1] : vector<2x16x64xf32> to vector<2x64xf32>
    %24 = vector.shape_cast %23 : vector<2x64xf32> to vector<2x1x64xf32>
    %25 = tpu.reciprocal %24 : vector<2x1x64xf32> -> vector<2x1x64xf32>
    %26 = vector.broadcast %25 : vector<2x1x64xf32> to vector<2x16x64xf32>
    %27 = arith.mulf %22, %26 : vector<2x16x64xf32>
    "tpu.trace_start"() <{level = 10 : i32, message = "bks,bcs->bkc"}> : () -> ()
    %cst_10 = arith.constant dense<0.000000e+00> : vector<2x16x128xf32>
    %28 = tpu.matmul %27, %8, %cst_10 {dimension_numbers = #tpu.dot_dimension_numbers<[2], [2], [1], [1], [0, 0, 0, 1, 1, 1], [0], [0]>} : vector<2x16x64xf32>, vector<2x128x64xf32>, vector<2x16x128xf32> -> vector<2x16x128xf32>
    "tpu.trace_stop"() : () -> ()
    %cst_11 = arith.constant dense<0.000000e+00> : vector<2x16xf32>
    %29 = vector.multi_reduction <add>, %27, %cst_11 [2] : vector<2x16x64xf32> to vector<2x16xf32>
    %30 = vector.shape_cast %29 : vector<2x16xf32> to vector<2x16x1xf32>
    %c0_12 = arith.constant 0 : index
    %c0_13 = arith.constant 0 : index
    %31 = vector.load %arg4[%c0_12, %c0_13] : memref<16x128xf32, #tpu.memory_space<vmem>>, vector<16x128xf32>
    %32 = vector.shape_cast %31 : vector<16x128xf32> to vector<1x16x128xf32>
    %33 = vector.broadcast %30 : vector<2x16x1xf32> to vector<2x16x128xf32>
    %34 = vector.broadcast %32 : vector<1x16x128xf32> to vector<2x16x128xf32>
    %35 = arith.mulf %33, %34 : vector<2x16x128xf32>
    %36 = arith.subf %28, %35 : vector<2x16x128xf32>
    %37 = arith.mulf %36, %36 : vector<2x16x128xf32>
    %cst_14 = arith.constant dense<0.000000e+00> : vector<2x16xf32>
    %38 = vector.multi_reduction <add>, %37, %cst_14 [2] : vector<2x16x128xf32> to vector<2x16xf32>
    %39 = vector.shape_cast %38 : vector<2x16xf32> to vector<2x16x1xf32>
    %cst_15 = arith.constant 1.000000e-24 : f32
    %40 = vector.broadcast %cst_15 : f32 to vector<2x16x1xf32>
    %41 = arith.maximumf %39, %40 : vector<2x16x1xf32>
    %42 = math.rsqrt %41 : vector<2x16x1xf32>
    %43 = arith.mulf %39, %42 : vector<2x16x1xf32>
    %44 = arith.mulf %43, %42 : vector<2x16x1xf32>
    %cst_16 = arith.constant dense<0.000000e+00> : vector<2x1xf32>
    %45 = vector.multi_reduction <add>, %44, %cst_16 [1] : vector<2x16x1xf32> to vector<2x1xf32>
    %46 = vector.shape_cast %45 : vector<2x1xf32> to vector<2x1x1xf32>
    %cst_17 = arith.constant 1.000000e-24 : f32
    %47 = vector.broadcast %cst_17 : f32 to vector<2x1x1xf32>
    %48 = arith.maximumf %46, %47 : vector<2x1x1xf32>
    %49 = math.rsqrt %48 : vector<2x1x1xf32>
    %50 = vector.broadcast %49 : vector<2x1x1xf32> to vector<2x16x1xf32>
    %51 = arith.mulf %42, %50 : vector<2x16x1xf32>
    %52 = vector.broadcast %51 : vector<2x16x1xf32> to vector<2x16x128xf32>
    %53 = arith.mulf %36, %52 : vector<2x16x128xf32>
    %c0_18 = arith.constant 0 : index
    %c0_19 = arith.constant 0 : index
    %c0_20 = arith.constant 0 : index
    %54 = vector.load %arg5[%c0_18, %c0_19, %c0_20] : memref<2x16x128xf32, #tpu.memory_space<vmem>>, vector<2x16x128xf32>
    tpu.vector_store %arg5[%c0_18, %c0_19, %c0_20], %53 {strides = array<i32>} : memref<2x16x128xf32, #tpu.memory_space<vmem>>, vector<2x16x128xf32>,
    return
  }
  func.func @transform_0(%arg0: i32) -> (i32, i32, i32) {
    %c0_i32 = arith.constant 0 : i32
    %c0_i32_0 = arith.constant 0 : i32
    %c0_i32_1 = arith.constant 0 : i32
    return %arg0, %c0_i32, %c0_i32_0 : i32, i32, i32
  }
  func.func @transform_1(%arg0: i32) -> (i32, i32) {
    %c0_i32 = arith.constant 0 : i32
    %c0_i32_0 = arith.constant 0 : i32
    %c0_i32_1 = arith.constant 0 : i32
    return %c0_i32, %c0_i32_0 : i32, i32
  }
  func.func @transform_2(%arg0: i32) -> (i32, i32) {
    %c0_i32 = arith.constant 0 : i32
    %c0_i32_0 = arith.constant 0 : i32
    %c0_i32_1 = arith.constant 0 : i32
    return %c0_i32, %c0_i32_0 : i32, i32
  }
  func.func @transform_3(%arg0: i32) -> (i32, i32) {
    %c0_i32 = arith.constant 0 : i32
    %c0_i32_0 = arith.constant 0 : i32
    %c0_i32_1 = arith.constant 0 : i32
    return %c0_i32, %c0_i32_0 : i32, i32
  }
  func.func @transform_4(%arg0: i32) -> (i32, i32, i32) {
    %c0_i32 = arith.constant 0 : i32
    %c0_i32_0 = arith.constant 0 : i32
    %c0_i32_1 = arith.constant 0 : i32
    return %arg0, %c0_i32, %c0_i32_0 : i32, i32, i32
  }
}

</mosaic_0001>

<bundles_post_ra>
// kernel: _netvlad_call.1
= control target key start
LH: loop header
LB: loop body
LE: loop exit
PB: predicated region body
PF: predicated region fallthrough
CT: control target
= control target key end

     0   :  { %s1490_s15 = smov 0   ;;  %s1905_s0 = inlined_call_operand.vmem [shape: f32[8,128,64], index: 0, kind: input, shape index: {}]   ;;  %s1906_s1 = inlined_call_operand.vmem [shape: f32[16,128], index: 1, kind: input, shape index: {}]   ;;  %s1907_s2 = inlined_call_operand.vmem [shape: f32[16,1], index: 2, kind: input, shape index: {}]   ;;  %s1908_s3 = inlined_call_operand.vmem [shape: f32[16,128], index: 3, kind: input, shape index: {}]   ;;  %s1909_s4 = inlined_call_operand.vmem [shape: f32[8,16,128], index: 4, kind: output, shape index: {}]  }
   0x1 LB: > { %s995_s16 = sadd.s32 4294967295, %s1462_s15   ;;  %p999_p0 = scmp.ge.s32.totalorder %s1462_s15, 1  ;;  %s1462_s15 = sphi %s1490_s15, %s14_s15  }
   0x2   : > { %p164_p1 = scmp.lt.s32.totalorder %s1462_s15, 5 }
   0x4   : > { %p165_p2 = pnand %p999_p0, %p164_p1 }
   0x5   : > { %s1000_s17 = sshll.u32 (!%p165_p2), %s995_s16, 1  ;;  %v381_v0 = vld [vmem:[%s1906_s1] sm:$0xff] (!%p165_p2)  ;;  %v1464_v2 = vmov (!%p165_p2), 0   ;;  %v384_v3 = vld [vmem:[%s1907_s2 + $0x8] sm:$0xff] (!%p165_p2)  ;;  %vm270_vm0 = vcmask (!%p165_p2), 523264  }
   0x6   : > { %168 = sbr.rel (%p165_p2) target bundleno = 805 (0x325), region = 36  ;;  %v383_v1 = vld [vmem:[%s1907_s2] sm:$0xff] (!%p165_p2)  ;;  %p193_p3 = scmp.lt.s32.totalorder (!%p165_p2), %s1000_s17, 7  ;;  %1150 = vmatprep.mubr.f32.mxu0 (!%p165_p2), %v381_v0  ;;  %1185 = vmatprep.mubr.f32.mxu1 (!%p165_p2), %v381_v0  ;;  %vm1775_vm1 = vmpackc.low (!%p165_p2), %vm270_vm0, %vm270_vm0 }
   0x7   : > { %1427 = vset.pattern.permute.xlu0 (!%p165_p2), %v1464_v2 }
   0x8   : > { %387 = vperm.xlu0 (!%p165_p2), %1427, %v383_v1  }
   0xc   : > { %392 = vperm.xlu0 (!%p165_p2), %1427, %v384_v3  }
   0xd   : > { %s1913_s17 = smov (!%p193_p3, %s1000_s17), 7 }
   0xe   : > { %s1044_s24 = sshll.u32 %s1913_s17, 7  ;;  %s1045_s8 = sshll.u32 %s1913_s17, 4 }
   0xf   : > { %s1513_s27 = scalar_lea.vmem %s1905_s0, %s1044_s24  ;;  %s204_s11 = scalar_lea.vmem %s1909_s4, %s1045_s8 }
  0x10   : > { %v1516_v4 = vld [vmem:[%s1513_s27] sm:$0xff]  ;;  %v1519_v5 = vld [vmem:[%s1513_s27 + $0x8] sm:$0xff]  ;;  %v1522_v6 = vld [vmem:[%s1513_s27 + $0x10] sm:$0xff] }
  0x11   : > { %v1525_v7 = vld [vmem:[%s1513_s27 + $0x18] sm:$0xff]  ;;  %v1528_v8 = vld [vmem:[%s1513_s27 + $0x20] sm:$0xff]  ;;  %v238_v9 = vmul.f32 %v1516_v4, %v1516_v4  ;;  %v239_v10 = vmul.f32 %v1519_v5, %v1519_v5  ;;  %v240_v11 = vmul.f32 %v1522_v6, %v1522_v6  ;;  %v1539_v13 = vld [vmem:[%s1513_s27 + $0x28] sm:$0xff] }
  0x12   : > { %v241_v12 = vmul.f32 %v1525_v7, %v1525_v7  ;;  %v242_v15 = vmul.f32 %v1528_v8, %v1528_v8  ;;  %v1546_v17 = vld [vmem:[%s1513_s27 + $0x30] sm:$0xff]  ;;  %v243_v19 = vmul.f32 %v1539_v13, %v1539_v13  ;;  %v1553_v22 = vld [vmem:[%s1513_s27 + $0x38] sm:$0xff]  ;;  %v1556_v24 = vld [vmem:[%s1513_s27 + $0x80] sm:$0xff] }
  0x13   : > { %v271_v14 = vsel %vm270_vm0, %v238_v9, 0.0  ;;  %v272_v16 = vsel %vm270_vm0, %v239_v10, 0.0  ;;  %v274_v20 = vsel %vm270_vm0, %v240_v11, 0.0  ;;  %v244_v25 = vmul.f32 %v1546_v17, %v1546_v17  ;;  %v1562_v27 = vld [vmem:[%s1513_s27 + $0x88] sm:$0xff]  ;;  %v1565_v28 = vld [vmem:[%s1513_s27 + $0x90] sm:$0xff]  ;;  %v1568_v29 = vld [vmem:[%s1513_s27 + $0x40] sm:$0xff] }
  0x14   : > { %v273_v18 = vadd.f32 %v272_v16, %v271_v14  ;;  %v276_v21 = vsel %vm270_vm0, %v241_v12, 0.0  ;;  %v278_v26 = vsel %vm270_vm0, %v242_v15, 0.0  ;;  %v245_v31 = vmul.f32 %v1553_v22, %v1553_v22  ;;  %v1574_v33 = vld [vmem:[%s1513_s27 + $0x98] sm:$0xff]  ;;  %v1579_v35 = vld [vmem:[%s1513_s27 + $0x48] sm:$0xff]  ;;  %v1589_v41 = vld [vmem:[%s1513_s27 + $0xa0] sm:$0xff] }
  0x15   : > { %v280_v32 = vsel %vm270_vm0, %v243_v19, 0.0  ;;  %v254_v34 = vmul.f32 %v1556_v24, %v1556_v24  ;;  %v255_v37 = vmul.f32 %v1562_v27, %v1562_v27  ;;  %v256_v38 = vmul.f32 %v1565_v28, %v1565_v28  ;;  %v1592_v42 = vld [vmem:[%s1513_s27 + $0x50] sm:$0xff]  ;;  %v1600_v47 = vld [vmem:[%s1513_s27 + $0xa8] sm:$0xff]  ;;  %v1604_v49 = vld [vmem:[%s1513_s27 + $0x58] sm:$0xff] }
  0x16   : > { %v275_v23 = vadd.f32 %v274_v20, %v273_v18  ;;  %v246_v39 = vmul.f32 %v1568_v29, %v1568_v29  ;;  %v282_v40 = vsel %vm270_vm0, %v244_v25, 0.0  ;;  %v257_v44 = vmul.f32 %v1574_v33, %v1574_v33  ;;  %v1614_v56 = vld [vmem:[%s1513_s27 + $0xb0] sm:$0xff]  ;;  %v1617_v58 = vld [vmem:[%s1513_s27 + $0x60] sm:$0xff]  ;;  %v1626_v0 = vld [vmem:[%s1513_s27 + $0xb8] sm:$0xff] }
  0x17   : > { %v247_v45 = vmul.f32 %v1579_v35, %v1579_v35  ;;  %v284_v46 = vsel %vm270_vm0, %v245_v31, 0.0  ;;  %v308_v48 = vsel %vm270_vm0, %v254_v34, 0.0  ;;  %v258_v51 = vmul.f32 %v1589_v41, %v1589_v41  ;;  %v1629_v2 = vld [vmem:[%s1513_s27 + $0x68] sm:$0xff]  ;;  %v1638_v14 = vld [vmem:[%s1513_s27 + $0xc0] sm:$0xff]  ;;  %v1641_v16 = vld [vmem:[%s1513_s27 + $0x70] sm:$0xff] }
  0x18   : > { %v277_v30 = vadd.f32 %v276_v21, %v275_v23  ;;  %v309_v52 = vsel %vm270_vm0, %v255_v37, 0.0  ;;  %v311_v53 = vsel %vm270_vm0, %v256_v38, 0.0  ;;  %v248_v54 = vmul.f32 %v1592_v42, %v1592_v42  ;;  %v1650_v25 = vld [vmem:[%s1513_s27 + $0xc8] sm:$0xff]  ;;  %v1662_v38 = vld [vmem:[%s1513_s27 + $0xd0] sm:$0xff] }
  0x19   : > { %v286_v55 = vsel %vm270_vm0, %v246_v39, 0.0  ;;  %v310_v57 = vadd.f32 %v309_v52, %v308_v48  ;;  %v259_v60 = vmul.f32 %v1600_v47, %v1600_v47  ;;  %v313_v61 = vsel %vm270_vm0, %v257_v44, 0.0  ;;  %v1671_v48 = vld [vmem:[%s1513_s27 + $0xd8] sm:$0xff] }
  0x1a   : > { %v279_v36 = vadd.f32 %v278_v26, %v277_v30  ;;  %v249_v62 = vmul.f32 %v1604_v49, %v1604_v49  ;;  %v288_v63 = vsel %vm270_vm0, %v247_v45, 0.0  ;;  %v260_v9 = vmul.f32 %v1614_v56, %v1614_v56  ;;  %v1653_v30 = vld [vmem:[%s1513_s27 + $0x78] sm:$0xff] }
  0x1b   : > { %v312_v1 = vadd.f32 %v311_v53, %v310_v57  ;;  %v315_v10 = vsel %vm270_vm0, %v258_v51, 0.0  ;;  %v250_v11 = vmul.f32 %v1617_v58, %v1617_v58  ;;  %v290_v12 = vsel %vm270_vm0, %v248_v54, 0.0 }
  0x1c   : > { %v281_v43 = vadd.f32 %v280_v32, %v279_v36  ;;  %v261_v19 = vmul.f32 %v1626_v0, %v1626_v0  ;;  %v317_v20 = vsel %vm270_vm0, %v259_v60, 0.0  ;;  %v251_v21 = vmul.f32 %v1629_v2, %v1629_v2 }
  0x1d   : > { %v314_v15 = vadd.f32 %v313_v61, %v312_v1  ;;  %v292_v23 = vsel %vm270_vm0, %v249_v62, 0.0  ;;  %v262_v32 = vmul.f32 %v1638_v14, %v1638_v14  ;;  %v319_v34 = vsel %vm270_vm0, %v260_v9, 0.0 }
  0x1e   : > { %v283_v50 = vadd.f32 %v282_v40, %v281_v43  ;;  %v252_v36 = vmul.f32 %v1641_v16, %v1641_v16  ;;  %v294_v37 = vsel %vm270_vm0, %v250_v11, 0.0  ;;  %v263_v43 = vmul.f32 %v1650_v25, %v1650_v25  ;;  %v1691_v11 = vld [vmem:[%s1513_s27 + $0xf0] sm:$0xff] }
  0x1f   : > { %v316_v26 = vadd.f32 %v315_v10, %v314_v15  ;;  %v321_v44 = vsel %vm270_vm0, %v261_v19, 0.0  ;;  %v253_v45 = vmul.f32 %v1653_v30, %v1653_v30  ;;  %v264_v52 = vmul.f32 %v1662_v38, %v1662_v38 }
  0x20   : > { %v285_v59 = vadd.f32 %v284_v46, %v283_v50  ;;  %v296_v46 = vsel %vm270_vm0, %v251_v21, 0.0  ;;  %v323_v53 = vsel %vm270_vm0, %v262_v32, 0.0  ;;  %v298_v54 = vsel %vm270_vm0, %v252_v36, 0.0 }
  0x21   : > { %v318_v39 = vadd.f32 %v317_v20, %v316_v26  ;;  %v265_v60 = vmul.f32 %v1671_v48, %v1671_v48  ;;  %v325_v61 = vsel %vm270_vm0, %v263_v43, 0.0  ;;  %v300_v62 = vsel %vm270_vm0, %v253_v45, 0.0  ;;  %v1697_v20 = vld [vmem:[%s1513_s27 + $0xf8] sm:$0xff] }
  0x22   : > { %v287_v3 = vadd.f32 %v286_v55, %v285_v59  ;;  %v1678_v55 = vld [vmem:[%s1513_s27 + $0xe0] sm:$0xff]  ;;  %v327_v10 = vsel %vm270_vm0, %v264_v52, 0.0  ;;  %v268_v26 = vmul.f32 %v1691_v11, %v1691_v11  ;;  %v269_v36 = vmul.f32 %v1697_v20, %v1697_v20 }
  0x23   : > { %v320_v50 = vadd.f32 %v319_v34, %v318_v39  ;;  %v266_v9 = vmul.f32 %v1678_v55, %v1678_v55  ;;  %v329_v19 = vsel %vm270_vm0, %v265_v60, 0.0 }
  0x24   : > { %v289_v18 = vadd.f32 %v288_v63, %v287_v3  ;;  %v1685_v63 = vld [vmem:[%s1513_s27 + $0xe8] sm:$0xff]  ;;  %v335_v43 = vsel %vm270_vm0, %v268_v26, 0.0 }
  0x25   : > { %v322_v57 = vadd.f32 %v321_v44, %v320_v50 }
  0x26   : > { %v291_v31 = vadd.f32 %v290_v12, %v289_v18  ;;  %v267_v18 = vmul.f32 %v1685_v63, %v1685_v63 }
  0x27   : > { %v324_v1 = vadd.f32 %v323_v53, %v322_v57 }
  0x28   : > { %v293_v40 = vadd.f32 %v292_v23, %v291_v31  ;;  %v331_v31 = vsel %vm270_vm0, %v266_v9, 0.0 }
  0x29   : > { %v326_v12 = vadd.f32 %v325_v61, %v324_v1 }
  0x2a   : > { %v295_v51 = vadd.f32 %v294_v37, %v293_v40  ;;  %v333_v37 = vsel %vm270_vm0, %v267_v18, 0.0 }
  0x2b   : > { %v328_v21 = vadd.f32 %v327_v10, %v326_v12 }
  0x2c   : > { %v297_v59 = vadd.f32 %v296_v46, %v295_v51  ;;  %v337_v46 = vsel %vm270_vm0, %v269_v36, 0.0 }
  0x2d   : > { %v330_v32 = vadd.f32 %v329_v19, %v328_v21 }
  0x2e   : > { %v299_v3 = vadd.f32 %v298_v54, %v297_v59 }
  0x2f   : > { %v332_v39 = vadd.f32 %v331_v31, %v330_v32 }
  0x30   : > { %v301_v15 = vadd.f32 %v300_v62, %v299_v3 }
  0x31   : > { %v334_v44 = vadd.f32 %v333_v37, %v332_v39 }
  0x32   : > { %v302_v23 = vrot.slane %v301_v15, 4 }
  0x33   : > { %v336_v50 = vadd.f32 %v335_v43, %v334_v44 }
  0x34   : > { %v303_v34 = vadd.f32 %v302_v23, %v301_v15 }
  0x35   : > { %v338_v52 = vadd.f32 %v337_v46, %v336_v50 }
  0x36   : > { %v304_v40 = vrot.slane %v303_v34, 2 }
  0x37   : > { %v339_v54 = vrot.slane %v338_v52, 4 }
  0x38   : > { %v305_v45 = vadd.f32 %v304_v40, %v303_v34 }
  0x39   : > { %v340_v59 = vadd.f32 %v339_v54, %v338_v52 }
  0x3a   : > { %v306_v51 = vrot.slane %v305_v45, 1 }
  0x3b   : > { %v341_v60 = vrot.slane %v340_v59, 2 }
  0x3c   : > { %v307_v53 = vadd.f32 %v306_v51, %v305_v45 }
  0x3d   : > { %v342_v61 = vadd.f32 %v341_v60, %v340_v59 }
  0x3e   : > { %v345_v57 = vmax.f32 %v307_v53, 1e-24 }
  0x3f   : > { %v343_v62 = vrot.slane %v342_v61, 1 }
  0x40   : > { %1428 = vrsqrt.f32 %v345_v57 }
  0x41   : > { %v344_v1 = vadd.f32 %v343_v62, %v342_v61 }
  0x43   : > { %v346_v3 = vmax.f32 %v344_v1, 1e-24 }
  0x45   : > { %1430 = vrsqrt.f32 %v346_v3 }
  0x4a   : > { %v1429_v9 = vpop.eup %1428 }
  0x4b   : > { %v349_v10 = vmul.f32 %v1429_v9, %v1516_v4  ;;  %v350_v12 = vmul.f32 %v1429_v9, %v1519_v5  ;;  %v351_v15 = vmul.f32 %v1429_v9, %v1522_v6  ;;  %v352_v18 = vmul.f32 %v1429_v9, %v1525_v7 }
  0x4c   : > { %v353_v21 = vmul.f32 %v1429_v9, %v1528_v8  ;;  %v354_v23 = vmul.f32 %v1429_v9, %v1539_v13  ;;  %v355_v5 = vmul.f32 %v1429_v9, %v1546_v17  ;;  %v356_v6 = vmul.f32 %v1429_v9, %v1553_v22 }
  0x4d   : > { %v1711_v19 = vpack.c.bf16 %v350_v12, %v349_v10  ;;  %v1715_v26 = vpack.c.bf16 %v352_v18, %v351_v15  ;;  %v357_v13 = vmul.f32 %v1429_v9, %v1568_v29  ;;  %v358_v31 = vmul.f32 %v1429_v9, %v1579_v35 }
  0x4e   : > { %v1720_v4 = vpack.c.bf16 %v354_v23, %v353_v21  ;;  %v1726_v8 = vpack.c.bf16 %v356_v6, %v355_v5  ;;  %v363_v44 = vmul.f32 %v1429_v9, %v1641_v16 }
  0x4f   : > { %1259 = vmatprep.subr.bf16.mxu0 %v1711_v19  ;;  %v1431_v7 = vpop.eup %1430  ;;  %v1742_v29 = vpack.c.bf16 %v358_v31, %v357_v13 }
  0x50   : > { %1261 = vmatpush3.bf16.msra.mxu0 %v1711_v19  ;;  %v365_v32 = vmul.f32 %v1431_v7, %v1556_v24  ;;  %v366_v34 = vmul.f32 %v1431_v7, %v1562_v27  ;;  %v367_v36 = vmul.f32 %v1431_v7, %v1565_v28  ;;  %v368_v17 = vmul.f32 %v1431_v7, %v1574_v33 }
  0x51   : > { %1263 = vmatprep.subr.bf16.mxu0 %v1715_v26  ;;  %v369_v39 = vmul.f32 %v1431_v7, %v1589_v41  ;;  %v370_v40 = vmul.f32 %v1431_v7, %v1600_v47  ;;  %v359_v24 = vmul.f32 %v1429_v9, %v1592_v42  ;;  %v360_v27 = vmul.f32 %v1429_v9, %v1604_v49 }
  0x52   : > { %v1734_v22 = vpack.c.bf16 %v366_v34, %v365_v32  ;;  %v1736_v37 = vpack.c.bf16 %v368_v17, %v367_v36  ;;  %v371_v33 = vmul.f32 %v1431_v7, %v1614_v56  ;;  %v372_v35 = vmul.f32 %v1431_v7, %v1626_v0 }
  0x53   : > { %v1749_v28 = vpack.c.bf16 %v370_v40, %v369_v39  ;;  %v1755_v41 = vpack.c.bf16 %v360_v27, %v359_v24  ;;  %v361_v42 = vmul.f32 %v1429_v9, %v1617_v58  ;;  %v362_v47 = vmul.f32 %v1429_v9, %v1629_v2 }
  0x54   : > { %1265 = vmatpush3.bf16.msra.mxu0 %v1715_v26  ;;  %1291 = vmatprep.subr.bf16.mxu1 %v1734_v22  ;;  %v1302_v49 = vpack.c.bf16 %v372_v35, %v371_v33  ;;  %v373_v43 = vmul.f32 %v1431_v7, %v1638_v14  ;;  %v374_v56 = vmul.f32 %v1431_v7, %v1650_v25 }
  0x55   : > { %1267 = vmatprep.subr.bf16.mxu0 %v1720_v4  ;;  %1293 = vmatpush3.bf16.msra.mxu1 %v1734_v22  ;;  %v1282_v0 = vpack.c.bf16 %v362_v47, %v361_v42  ;;  %v364_v58 = vmul.f32 %v1429_v9, %v1653_v30  ;;  %v375_v45 = vmul.f32 %v1431_v7, %v1662_v38 }
  0x56   : > { %1295 = vmatprep.subr.bf16.mxu1 %v1736_v37  ;;  %v1306_v2 = vpack.c.bf16 %v374_v56, %v373_v43  ;;  %v376_v46 = vmul.f32 %v1431_v7, %v1671_v48  ;;  %v377_v50 = vmul.f32 %v1431_v7, %v1678_v55  ;;  %v378_v16 = vmul.f32 %v1431_v7, %v1685_v63  ;;  %v382_v55 = vld [vmem:[%s1906_s1 + $0x8] sm:$0xff] }
  0x57   : > { %v1286_v14 = vpack.c.bf16 %v364_v58, %v363_v44  ;;  %v379_v48 = vmul.f32 %v1431_v7, %v1691_v11  ;;  %v380_v51 = vmul.f32 %v1431_v7, %v1697_v20 }
  0x58   : > { %1269 = vmatpush3.bf16.msra.mxu0 %v1720_v4  ;;  %v1310_v25 = vpack.c.bf16 %v376_v46, %v375_v45  ;;  %v1314_v38 = vpack.c.bf16 %v378_v16, %v377_v50 }
  0x59   : > { %1271 = vmatprep.subr.bf16.mxu0 %v1726_v8  ;;  %1297 = vmatpush3.bf16.msra.mxu1 %v1736_v37  ;;  %v1318_v63 = vpack.c.bf16 %v380_v51, %v379_v48 }
  0x5a   : > { %1299 = vmatprep.subr.bf16.mxu1 %v1749_v28 }
  0x5c   : > { %1273 = vmatpush3.bf16.msra.mxu0 %v1726_v8 }
  0x5d   : > { %1275 = vmatprep.subr.bf16.mxu0 %v1742_v29  ;;  %1301 = vmatpush3.bf16.msra.mxu1 %v1749_v28 }
  0x5e   : > { %1303 = vmatprep.subr.bf16.mxu1 %v1302_v49 }
  0x60   : > { %1277 = vmatpush3.bf16.msra.mxu0 %v1742_v29 }
  0x61   : > { %1279 = vmatprep.subr.bf16.mxu0 %v1755_v41  ;;  %1305 = vmatpush3.bf16.msra.mxu1 %v1302_v49 }
  0x62   : > { %1307 = vmatprep.subr.bf16.mxu1 %v1306_v2 }
  0x64   : > { %1281 = vmatpush3.bf16.msra.mxu0 %v1755_v41 }
  0x65   : > { %1283 = vmatprep.subr.bf16.mxu0 %v1282_v0  ;;  %1309 = vmatpush3.bf16.msra.mxu1 %v1306_v2 }
  0x66   : > { %1311 = vmatprep.subr.bf16.mxu1 %v1310_v25 }
  0x68   : > { %1285 = vmatpush3.bf16.msra.mxu0 %v1282_v0 }
  0x69   : > { %1287 = vmatprep.subr.bf16.mxu0 %v1286_v14  ;;  %1313 = vmatpush3.bf16.msra.mxu1 %v1310_v25 }
  0x6a   : > { %1315 = vmatprep.subr.bf16.mxu1 %v1314_v38 }
  0x6c   : > { %1289 = vmatpush3.bf16.msra.mxu0 %v1286_v14 }
  0x6d   : > { %1324 = vmatprep.subr.msk.bf16.mxu0 %vm1775_vm1, %v1711_v19  ;;  %1317 = vmatpush3.bf16.msra.mxu1 %v1314_v38 }
  0x6e   : > { %1319 = vmatprep.subr.bf16.mxu1 %v1318_v63 }
  0x6f   : > { %1151 = vmatmul.mubr.f32.vlgmr.msra.gmra.mrb[0].mxu0 %v382_v55 }
  0x71   : > { %1321 = vmatpush3.bf16.msra.mxu1 %v1318_v63 }
  0x72   : > { %1372 = vmatprep.subr.msk.bf16.mxu1 %vm1775_vm1, %v1734_v22 }
  0x74   : > { %1186 = vmatmul.mubr.f32.vlgmr.msra.gmra.mrb[0].mxu1 %v382_v55 }
  0x75   : > { %1327 = vmatpush3.bf16.xpose.msk.msra.mxu0 %vm1775_vm1, %v1711_v19 }
  0x76   : > { %1330 = vmatprep.subr.msk.bf16.mxu0 %vm1775_vm1, %v1715_v26 }
  0x7a   : > { %1375 = vmatpush3.bf16.xpose.msk.msra.mxu1 %vm1775_vm1, %v1734_v22 }
  0x7b   : > { %1378 = vmatprep.subr.msk.bf16.mxu1 %vm1775_vm1, %v1736_v37 }
  0x7d   : > { %1333 = vmatpush3.bf16.xpose.msk.msra.mxu0 %vm1775_vm1, %v1715_v26 }
  0x7e   : > { %1336 = vmatprep.subr.msk.bf16.mxu0 %vm1775_vm1, %v1720_v4 }
  0x82   : > { %1381 = vmatpush3.bf16.xpose.msk.msra.mxu1 %vm1775_vm1, %v1736_v37 }
  0x83   : > { %1384 = vmatprep.subr.msk.bf16.mxu1 %vm1775_vm1, %v1749_v28 }
  0x85   : > { %1339 = vmatpush3.bf16.xpose.msk.msra.mxu0 %vm1775_vm1, %v1720_v4 }
  0x86   : > { %1342 = vmatprep.subr.msk.bf16.mxu0 %vm1775_vm1, %v1726_v8 }
  0x87   : > { %v388_v11 = vpop.permute.xlu0 %387 }
  0x8a   : > { %1387 = vmatpush3.bf16.xpose.msk.msra.mxu1 %vm1775_vm1, %v1749_v28 }
  0x8b   : > { %1390 = vmatprep.subr.msk.bf16.mxu1 %vm1775_vm1, %v1302_v49  ;;  %v393_v20 = vpop.permute.xlu0 %392 }
  0x8d   : > { %1345 = vmatpush3.bf16.xpose.msk.msra.mxu0 %vm1775_vm1, %v1726_v8 }
  0x8e   : > { %1348 = vmatprep.subr.msk.bf16.mxu0 %vm1775_vm1, %v1742_v29 }
  0x92   : > { %1393 = vmatpush3.bf16.xpose.msk.msra.mxu1 %vm1775_vm1, %v1302_v49 }
  0x93   : > { %1396 = vmatprep.subr.msk.bf16.mxu1 %vm1775_vm1, %v1306_v2 }
  0x95   : > { %1351 = vmatpush3.bf16.xpose.msk.msra.mxu0 %vm1775_vm1, %v1742_v29 }
  0x96   : > { %1354 = vmatprep.subr.msk.bf16.mxu0 %vm1775_vm1, %v1755_v41 }
  0x9a   : > { %1399 = vmatpush3.bf16.xpose.msk.msra.mxu1 %vm1775_vm1, %v1306_v2 }
  0x9b   : > { %1402 = vmatprep.subr.msk.bf16.mxu1 %vm1775_vm1, %v1310_v25 }
  0x9d   : > { %1357 = vmatpush3.bf16.xpose.msk.msra.mxu0 %vm1775_vm1, %v1755_v41 }
  0x9e   : > { %1360 = vmatprep.subr.msk.bf16.mxu0 %vm1775_vm1, %v1282_v0 }
  0xa2   : > { %1405 = vmatpush3.bf16.xpose.msk.msra.mxu1 %vm1775_vm1, %v1310_v25 }
  0xa3   : > { %1408 = vmatprep.subr.msk.bf16.mxu1 %vm1775_vm1, %v1314_v38 }
  0xa5   : > { %1363 = vmatpush3.bf16.xpose.msk.msra.mxu0 %vm1775_vm1, %v1282_v0 }
  0xa6   : > { %1366 = vmatprep.subr.msk.bf16.mxu0 %vm1775_vm1, %v1286_v14 }
  0xaa   : > { %1411 = vmatpush3.bf16.xpose.msk.msra.mxu1 %vm1775_vm1, %v1314_v38 }
  0xab   : > { %1414 = vmatprep.subr.msk.bf16.mxu1 %vm1775_vm1, %v1318_v63 }
  0xad   : > { %1369 = vmatpush3.bf16.xpose.msk.msra.mxu0 %vm1775_vm1, %v1286_v14 }
  0xb2   : > { %1417 = vmatpush3.bf16.xpose.msk.msra.mxu1 %vm1775_vm1, %v1318_v63 }
 0x142   : > { %v1152_v52 = vpop.f32.mrb[0].mxu0 }
 0x143   : > { %v467_v53 = vadd.f32 %v1152_v52, %v393_v20  ;;  %v461_v54 = vpop.f32.mrb[1].mxu0 }
 0x144   : > { %v462_v57 = vadd.f32 %v461_v54, %v388_v11 }
 0x145   : > { %v546_v59 = vsel %vm270_vm0, %v467_v53, -inf }
 0x146   : > { %v545_v60 = vsel %vm270_vm0, %v462_v57, -inf }
 0x147   : > { %v547_v61 = vmax.f32 %v545_v60, %v546_v59  ;;  %v1187_v3 = vpop.f32.mrb[0].mxu1  ;;  %v869_v60 = vld [vmem:[%s1908_s3] sm:$0xff] }
 0x148   : > { %v542_v10 = vadd.f32 %v1187_v3, %v393_v20  ;;  %v536_v12 = vpop.f32.mrb[1].mxu1 }
 0x149   : > { %v548_v62 = vrot.slane %v547_v61, 4  ;;  %v537_v18 = vadd.f32 %v536_v12, %v388_v11 }
 0x14a   : > { %v555_v19 = vsel %vm270_vm0, %v542_v10, -inf }
 0x14b   : > { %v549_v1 = vmax.f32 %v547_v61, %v548_v62  ;;  %v554_v23 = vsel %vm270_vm0, %v537_v18, -inf }
 0x14c   : > { %v556_v26 = vmax.f32 %v554_v23, %v555_v19 }
 0x14d   : > { %v550_v9 = vrot.slane %v549_v1, 2 }
 0x14e   : > { %v557_v5 = vrot.slane %v556_v26, 4 }
 0x14f   : > { %v551_v15 = vmax.f32 %v549_v1, %v550_v9 }
 0x150   : > { %v558_v8 = vmax.f32 %v556_v26, %v557_v5 }
 0x151   : > { %v552_v21 = vrot.slane %v551_v15, 1 }
 0x152   : > { %v559_v32 = vrot.slane %v558_v8, 2 }
 0x153   : > { %v553_v4 = vmax.f32 %v551_v15, %v552_v21 }
 0x154   : > { %v560_v34 = vmax.f32 %v558_v8, %v559_v32 }
 0x155   : > { %v563_v6 = vsub.f32 %v462_v57, %v553_v4  ;;  %v564_v7 = vsub.f32 %v467_v53, %v553_v4  ;;  %v870_v57 = vld [vmem:[%s1908_s3 + $0x8] sm:$0xff] }
 0x156   : > { %v561_v36 = vrot.slane %v560_v34, 1 }
 0x157   : > { %v567_v13 = vmul.f32 1.442695, %v563_v6  ;;  %v569_v31 = vmul.f32 1.442695, %v564_v7 }
 0x158   : > { %v562_v17 = vmax.f32 %v560_v34, %v561_v36 }
 0x159   : > { %1432 = vpow2.f32 %v567_v13 }
 0x15a   : > { %1434 = vpow2.f32 %v569_v31  ;;  %v565_v22 = vsub.f32 %v537_v18, %v562_v17  ;;  %v566_v37 = vsub.f32 %v542_v10, %v562_v17 }
 0x15c   : > { %v571_v39 = vmul.f32 1.442695, %v565_v22  ;;  %v573_v40 = vmul.f32 1.442695, %v566_v37 }
 0x15e   : > { %1436 = vpow2.f32 %v571_v39 }
 0x15f   : > { %1438 = vpow2.f32 %v573_v40 }
 0x163   : > { %v1433_v29 = vpop.eup %1432 }
 0x164   : > { %v1435_v24 = vpop.eup %1434  ;;  %v575_v27 = vsel %vm270_vm0, %v1433_v29, 0.0 }
 0x165   : > { %v576_v28 = vsel %vm270_vm0, %v1435_v24, 0.0 }
 0x166   : > { %v577_v33 = vadd.f32 %v576_v28, %v575_v27 }
 0x168   : > { %v578_v35 = vrot.slane %v577_v33, 4  ;;  %v1437_v47 = vpop.eup %1436 }
 0x169   : > { %v1439_v43 = vpop.eup %1438  ;;  %v584_v56 = vsel %vm270_vm0, %v1437_v47, 0.0 }
 0x16a   : > { %v579_v41 = vadd.f32 %v578_v35, %v577_v33  ;;  %v585_v0 = vsel %vm270_vm0, %v1439_v43, 0.0 }
 0x16b   : > { %v586_v58 = vadd.f32 %v585_v0, %v584_v56 }
 0x16c   : > { %v580_v42 = vrot.slane %v579_v41, 2 }
 0x16d   : > { %v587_v45 = vrot.slane %v586_v58, 4 }
 0x16e   : > { %v581_v49 = vadd.f32 %v580_v42, %v579_v41 }
 0x16f   : > { %v588_v46 = vadd.f32 %v587_v45, %v586_v58 }
 0x170   : > { %v582_v44 = vrot.slane %v581_v49, 1 }
 0x171   : > { %v589_v14 = vrot.slane %v588_v46, 2 }
 0x172   : > { %v583_v2 = vadd.f32 %v582_v44, %v581_v49 }
 0x173   : > { %v590_v25 = vadd.f32 %v589_v14, %v588_v46 }
 0x174   : > { %1440 = vrcp.f32 %v583_v2 }
 0x175   : > { %v591_v50 = vrot.slane %v590_v25, 1 }
 0x177   : > { %v592_v16 = vadd.f32 %v591_v50, %v590_v25 }
 0x179   : > { %1442 = vrcp.f32 %v592_v16 }
 0x17e   : > { %v1441_v30 = vpop.eup %1440 }
 0x17f   : > { %v595_v38 = vmul.f32 %v1441_v30, %v1433_v29  ;;  %v596_v48 = vmul.f32 %v1441_v30, %v1435_v24 }
 0x181   : > { %1220 = vmatprep.mubr.msk.f32.mxu0 %vm270_vm0, %v595_v38  ;;  %v857_v51 = vsel %vm270_vm0, %v595_v38, 0.0  ;;  %v860_v55 = vsel %vm270_vm0, %v596_v48, 0.0 }
 0x182   : > { %858 = vadd.xlane.f32.xlu1 %v857_v51  ;;  %1221 = vmatmul.mubr.msk.f32.vlgmr.msra.gmra.mrb[2].mxu0 %vm270_vm0, %v596_v48 }
 0x183   : > { %v1443_v63 = vpop.eup %1442 }
 0x184   : > { %v597_v11 = vmul.f32 %v1443_v63, %v1437_v47  ;;  %v598_v20 = vmul.f32 %v1443_v63, %v1439_v43 }
 0x186   : > { %861 = vadd.xlane.f32.xlu1 %v860_v55  ;;  %1255 = vmatprep.mubr.msk.f32.mxu1 %vm270_vm0, %v597_v11  ;;  %v863_v52 = vsel %vm270_vm0, %v597_v11, 0.0  ;;  %v866_v53 = vsel %vm270_vm0, %v598_v20, 0.0 }
 0x187   : > { %864 = vadd.xlane.f32.xlu0 %v863_v52  ;;  %1256 = vmatmul.mubr.msk.f32.vlgmr.msra.gmra.mrb[2].mxu1 %vm270_vm0, %v598_v20 }
 0x18a   : > { %867 = vadd.xlane.f32.xlu1 %v866_v53 }
 0x20f   : > { %v859_v54 = vpop.xlane.xlu1 %858 }
 0x210   : > { %v871_v1 = vmul.f32 %v869_v60, %v859_v54 }
 0x213   : > { %v862_v59 = vpop.xlane.xlu1 %861 }
 0x214   : > { %v872_v61 = vmul.f32 %v870_v57, %v862_v59  ;;  %v865_v18 = vpop.xlane.xlu0 %864 }
 0x215   : > { %v873_v21 = vmul.f32 %v869_v60, %v865_v18 }
 0x217   : > { %v868_v19 = vpop.xlane.xlu1 %867 }
 0x218   : > { %v874_v4 = vmul.f32 %v870_v57, %v868_v19 }
 0x255   : > { %v1222_v62 = vpop.f32.mrb[2].mxu0 }
 0x256   : > { %v1888_v3 = vsub.f32 %v1222_v62, %v872_v61  ;;  %v719_v9 = vpop.f32.mrb[3].mxu0 }
 0x257   : > { %v1890_v10 = vsub.f32 %v719_v9, %v871_v1 }
 0x258   : > { %v880_v12 = vmul.f32 %v1888_v3, %v1888_v3 }
 0x259   : > { %v879_v15 = vmul.f32 %v1890_v10, %v1890_v10 }
 0x25a   : > { %885 = vadd.xlane.f32.xlu1 %v880_v12  ;;  %v1257_v23 = vpop.f32.mrb[2].mxu1 }
 0x25b   : > { %v848_v26 = vpop.f32.mrb[3].mxu1  ;;  %v878_v6 = vsub.f32 %v1257_v23, %v874_v4 }
 0x25c   : > { %v877_v5 = vsub.f32 %v848_v26, %v873_v21 }
 0x25d   : > { %v882_v8 = vmul.f32 %v878_v6, %v878_v6 }
 0x25e   : > { %883 = vadd.xlane.f32.xlu1 %v879_v15  ;;  %v881_v7 = vmul.f32 %v877_v5, %v877_v5 }
 0x262   : > { %887 = vadd.xlane.f32.xlu1 %v881_v7 }
 0x266   : > { %889 = vadd.xlane.f32.xlu1 %v882_v8 }
 0x2e7   : > { %v886_v13 = vpop.xlane.xlu1 %885 }
 0x2e8   : > { %v892_v31 = vmax.f32 %v886_v13, 1e-24 }
 0x2ea   : > { %1444 = vrsqrt.f32 %v892_v31 }
 0x2eb   : > { %v884_v32 = vpop.xlane.xlu1 %883 }
 0x2ec   : > { %v891_v34 = vmax.f32 %v884_v32, 1e-24 }
 0x2ee   : > { %1446 = vrsqrt.f32 %v891_v34 }
 0x2ef   : > { %v888_v36 = vpop.xlane.xlu1 %887 }
 0x2f0   : > { %v893_v22 = vmax.f32 %v888_v36, 1e-24 }
 0x2f2   : > { %1448 = vrsqrt.f32 %v893_v22 }
 0x2f3   : > { %v890_v39 = vpop.xlane.xlu1 %889 }
 0x2f4   : > { %v1445_v17 = vpop.eup %1444  ;;  %v894_v29 = vmax.f32 %v890_v39, 1e-24 }
 0x2f5   : > { %v900_v37 = vmul.f32 %v1445_v17, %v886_v13 }
 0x2f6   : > { %1450 = vrsqrt.f32 %v894_v29 }
 0x2f7   : > { %v904_v27 = vmul.f32 %v1445_v17, %v900_v37 }
 0x2f8   : > { %v1447_v40 = vpop.eup %1446 }
 0x2f9   : > { %v899_v24 = vmul.f32 %v1447_v40, %v884_v32 }
 0x2fb   : > { %v903_v28 = vmul.f32 %v1447_v40, %v899_v24 }
 0x2fc   : > { %v1449_v41 = vpop.eup %1448 }
 0x2fd   : > { %v907_v33 = vadd.f32 %v904_v27, %v903_v28  ;;  %v901_v49 = vmul.f32 %v1449_v41, %v888_v36 }
 0x2ff   : > { %v908_v35 = vrot.slane %v907_v33, 4  ;;  %v905_v58 = vmul.f32 %v1449_v41, %v901_v49 }
 0x300   : > { %v1451_v43 = vpop.eup %1450 }
 0x301   : > { %v909_v42 = vadd.f32 %v908_v35, %v907_v33  ;;  %v902_v0 = vmul.f32 %v1451_v43, %v890_v39 }
 0x303   : > { %v910_v47 = vrot.slane %v909_v42, 2  ;;  %v906_v2 = vmul.f32 %v1451_v43, %v902_v0 }
 0x305   : > { %v911_v56 = vadd.f32 %v910_v47, %v909_v42  ;;  %v914_v46 = vadd.f32 %v906_v2, %v905_v58 }
 0x307   : > { %v912_v44 = vrot.slane %v911_v56, 1  ;;  %v915_v25 = vrot.slane %v914_v46, 4 }
 0x309   : > { %v913_v45 = vadd.f32 %v912_v44, %v911_v56  ;;  %v916_v50 = vadd.f32 %v915_v25, %v914_v46 }
 0x30b   : > { %v921_v14 = vmax.f32 %v913_v45, 1e-24  ;;  %v917_v16 = vrot.slane %v916_v50, 2 }
 0x30d   : > { %1452 = vrsqrt.f32 %v921_v14  ;;  %v918_v30 = vadd.f32 %v917_v16, %v916_v50 }
 0x30f   : > { %v919_v38 = vrot.slane %v918_v30, 1 }
 0x311   : > { %v920_v48 = vadd.f32 %v919_v38, %v918_v30 }
 0x313   : > { %v922_v55 = vmax.f32 %v920_v48, 1e-24 }
 0x315   : > { %1454 = vrsqrt.f32 %v922_v55 }
 0x317   : > { %v1453_v51 = vpop.eup %1452 }
 0x318   : > { %v925_v63 = vmul.f32 %v1453_v51, %v1447_v40  ;;  %v926_v11 = vmul.f32 %v1453_v51, %v1445_v17 }
 0x31a   : > { %v929_v20 = vmul.f32 %v925_v63, %v1890_v10  ;;  %v930_v52 = vmul.f32 %v926_v11, %v1888_v3 }
 0x31c   : > { %933 = vst [vmem:[%s204_s11] sm:$0xff] %v929_v20  ;;  %934 = vst [vmem:[%s204_s11 + $0x8] sm:$0xff] %v930_v52 }
 0x31f   : > { %v1455_v53 = vpop.eup %1454 }
 0x320   : > { %v927_v54 = vmul.f32 %v1455_v53, %v1449_v41  ;;  %v928_v57 = vmul.f32 %v1455_v53, %v1451_v43 }
 0x322   : > { %v931_v59 = vmul.f32 %v927_v54, %v877_v5  ;;  %v932_v60 = vmul.f32 %v928_v57, %v878_v6 }
 0x324   : > { %935 = vst [vmem:[%s204_s11 + $0x10] sm:$0xff] %v931_v59  ;;  %936 = vst [vmem:[%s204_s11 + $0x18] sm:$0xff] %v932_v60 }
 0x325 PF: > { %s14_s15 = sadd.s32 1, %s1462_s15  }
 0x326   : > { %p11_p4 = scmp.ge.s32.totalorder %s14_s15, 6  }
 0x328   :  { %13 = sbr.rel (!%p11_p4) target bundleno = 1 (0x1), region = 66 }

</bundles_post_ra>
